<compile_context>
chip_gen: v6e
topology: v6e:2x2x1
jax: 0.10.0
libtpu: 0.0.40
codegen_flags: <defaults>
</compile_context>

<pallas_src>
import functools

import jax
import jax.numpy as jnp
from jax.experimental import pallas as pl
from jax.experimental.pallas import tpu as pltpu

_MIB = 1024 * 1024


def _round_up(x, m):
    return ((x + m - 1) // m) * m


# ---------------------------------------------------------------------------
# Kernels
# ---------------------------------------------------------------------------
def _activate(scores, act):
    if act == "softmax":
        m = jnp.max(scores, axis=1, keepdims=True)
        e = jnp.exp(scores - m)
        denom = jnp.sum(e, axis=1, keepdims=True)
        # Exact divide: the approx (EUP vrcp) reciprocal broke the normalization
        # tolerance; this kernel is memory-bound so the exact divide is free.
        return e / denom
    return jax.nn.sigmoid(scores)


def _double_attention_kernel(h_ref, s_ref, k_ref, w_ref, a_ref, sc_ref,
                             *, act, score_mxu, ctx_mxu):
    """Standard layout: slots/keys blocks are (TB, N, D)."""
    h = h_ref[...]                      # (TB, D)
    s = s_ref[...]                      # (TB, N, D)
    k = k_ref[...]                      # (TB, N, D)

    if score_mxu:
        # Batched GEMV on the MXU (idle unit here): f32 accumulation, and no
        # f32 (TB, N, D) broadcast temporary in VMEM.
        sk = s + k
        scores = jnp.einsum("bnd,bd->bn", sk, h,
                            preferred_element_type=jnp.float32)          # (TB, N)
    else:
        # Small D: VPU multiply + cross-lane reduce; accumulate in f32 so
        # products are not rounded to the input dtype before the sum.
        skf = s.astype(jnp.float32) + k.astype(jnp.float32)
        scores = jnp.sum(skf * h.astype(jnp.float32)[:, None, :], axis=2)

    activated = _activate(scores, act)                                    # (TB, N)

    # weights[b, d] = sum_n activated[b, n] * slots[b, n, d]
    if ctx_mxu:
        # Cast to the slots dtype for the MXU (matches a low-precision bmm);
        # accumulation stays f32 via preferred_element_type.
        w = jnp.einsum("bn,bnd->bd", activated.astype(s.dtype), s,
                       preferred_element_type=jnp.float32)
    else:
        w = jnp.sum(activated[:, :, None] * s.astype(jnp.float32), axis=1)

    w_ref[...] = w.astype(w_ref.dtype)
    a_ref[...] = activated.astype(a_ref.dtype)
    sc_ref[...] = scores.astype(sc_ref.dtype)


def _double_attention_kernel_t(h_ref, st_ref, kt_ref, w_ref, a_ref, sc_ref,
                               *, act):
    """Transposed layout (D < 128, N >= 128): slots/keys blocks are (TB, D, N).

    N sits on the lane axis -> dense VMEM tiles (no D->128 lane padding), the
    D reduction is a cheap sublane-direction op, and the (TB, N) score /
    attention stores are lane-dense unmasked vst.
    """
    h = h_ref[...]                      # (TB, D)
    st = st_ref[...]                    # (TB, D, N)
    kt = kt_ref[...]                    # (TB, D, N)

    skf = st.astype(jnp.float32) + kt.astype(jnp.float32)
    scores = jnp.sum(skf * h.astype(jnp.float32)[:, :, None], axis=1)     # (TB, N)

    activated = _activate(scores, act)                                    # (TB, N)

    # weights[b, d] = sum_n activated[b, n] * slots_t[b, d, n]  (D < 128 -> VPU/XLU)
    w = jnp.sum(activated[:, None, :] * st.astype(jnp.float32), axis=2)   # (TB, D)

    w_ref[...] = w.astype(w_ref.dtype)
    a_ref[...] = activated.astype(a_ref.dtype)
    sc_ref[...] = scores.astype(sc_ref.dtype)


# ---------------------------------------------------------------------------
# Tiling / VMEM budgeting
# ---------------------------------------------------------------------------
def _tile_vmem_bytes(tb, N, D, in_dtype, transposed, vpu_score, vpu_ctx):
    """Conservative VMEM bytes for one grid step at batch-tile `tb`.

    Counts: double-buffered input AND output blocks, the f32 temporaries of the
    VPU paths, and (8,128)/lane + sublane-packing padding.
    """
    it = jnp.dtype(in_dtype).itemsize
    sub_in = max(8, 32 // it)           # sublane multiple: 8 (f32), 16 (bf16), 32 (int8)

    if transposed:                      # blocks are (tb, D, N), N on lanes
        blk_in = tb * _round_up(D, sub_in) * _round_up(N, 128) * it
        blk_f32 = tb * _round_up(D, 8) * _round_up(N, 128) * 4
    else:                               # blocks are (tb, N, D), D on lanes
        blk_in = tb * _round_up(N, sub_in) * _round_up(D, 128) * it
        blk_f32 = tb * _round_up(N, 8) * _round_up(D, 128) * 4

    hid = _round_up(tb, sub_in) * _round_up(D, 128) * it          # hidden block
    w_out = _round_up(tb, sub_in) * _round_up(D, 128) * it        # weights block
    an_out = _round_up(tb, 8) * _round_up(N, 128) * 4             # activated (f32)
    sc_out = an_out                                               # scores (f32)

    temps = 0
    if vpu_score:
        temps += 2 * blk_f32            # f32 upcast of (s+k) + broadcast product
    else:
        temps += blk_in                 # sk in input dtype feeding the MXU
    if vpu_ctx:
        temps += blk_f32                # broadcast product before the reduce

    # Pallas double-buffers every input and output block.
    return 2 * (2 * blk_in + hid + w_out + an_out + sc_out) + temps


def _choose_batch_tile(B, N, D, in_dtype, budget, transposed, vpu_score, vpu_ctx):
    size = functools.partial(_tile_vmem_bytes, N=N, D=D, in_dtype=in_dtype,
                             transposed=transposed, vpu_score=vpu_score,
                             vpu_ctx=vpu_ctx)
    if size(B) <= budget:
        return B                        # whole batch fits in one step
    if size(8) > budget:
        # Even an 8-row tile overflows: degrade gracefully to the smallest
        # sublane-aligned tile instead of loading the whole batch.
        # TODO(synk): add an N-tiling grid axis (online softmax) for this case.
        return min(8, B)
    tb = min((budget * 8) // size(8), B) // 8 * 8
    tb = max(8, tb)
    while tb > 8 and size(tb) > budget:
        tb -= 8
    return tb


def _vmem_budgets():
    """(per-step tile budget, vmem_limit_bytes), derived from the chip."""
    cap = None
    try:
        cap = int(pltpu.get_tpu_info().vmem_capacity_bytes)
    except Exception:
        cap = None
    if cap is not None and cap > 64 * _MIB:
        # v5e / v6e: 128 MiB VMEM — big tiles amortize per-step overhead.
        return 72 * _MIB, 100 * _MIB
    if cap is not None:
        # v7x-class: 64 MiB physical VMEM per TensorCore.
        vmem_limit = min(cap - 8 * _MIB, 56 * _MIB)
        return int(0.72 * vmem_limit), vmem_limit
    # Unknown (interpret / AOT): assume the smallest part (v7x).
    return 40 * _MIB, 56 * _MIB


def _block_spec(block_shape, index_map, extra_buffering=False):
    if extra_buffering:
        try:
            return pl.BlockSpec(block_shape, index_map,
                                pipeline_mode=pl.Buffered(3))
        except Exception:  # older jax: fall back to the default 2-deep pipeline
            pass
    return pl.BlockSpec(block_shape, index_map)


# ---------------------------------------------------------------------------
# Public wrapper
# ---------------------------------------------------------------------------
def double_attention(hidden, slots, keys, *, act="softmax", batch_tile=None):
    """Returns (weights, normalized_attention, raw_scores) — DoubleAttention.forward."""
    assert slots.shape == keys.shape
    B, N, D = slots.shape
    assert hidden.shape == (B, D)
    assert act in ("softmax", "sigmoid")

    in_dtype = slots.dtype
    itemsize = jnp.dtype(in_dtype).itemsize

    # Layout / compute-unit routing.
    transposed = (D < 128) and (N >= 128)            # lane-dense layout for small D
    score_mxu = (not transposed) and (D >= 128)
    ctx_mxu = (not transposed) and (D >= 128) and (N >= 128)

    tile_budget, vmem_limit = _vmem_budgets()
    if batch_tile is None:
        TB = _choose_batch_tile(B, N, D, in_dtype, tile_budget, transposed,
                                vpu_score=not score_mxu, vpu_ctx=not ctx_mxu)
        # Keep >= ~4 grid steps when the batch is big enough so both v7x
        # TensorCores get work and inbound/outbound DMA overlap.
        if B >= 32:
            TB = min(TB, _round_up(pl.cdiv(B, 4), 8))
    else:
        TB = batch_tile
    TB = max(1, min(TB, B))
    grid = (pl.cdiv(B, TB),)

    # Extra pipeline depth only pays when tiles are small (exposed DMA latency).
    extra_buf = (grid[0] >= 4) and (TB <= 64)

    if transposed:
        slots_in = jnp.swapaxes(slots, 1, 2)          # (B, D, N)
        keys_in = jnp.swapaxes(keys, 1, 2)
        kernel = functools.partial(_double_attention_kernel_t, act=act)
        big_block = (TB, D, N)
    else:
        slots_in = slots
        keys_in = keys
        kernel = functools.partial(_double_attention_kernel, act=act,
                                   score_mxu=score_mxu, ctx_mxu=ctx_mxu)
        big_block = (TB, N, D)

    in_specs = [
        pl.BlockSpec((TB, D), lambda i: (i, 0)),                       # hidden
        _block_spec(big_block, lambda i: (i, 0, 0), extra_buf),        # slots
        _block_spec(big_block, lambda i: (i, 0, 0), extra_buf),        # keys
    ]
    out_specs = (
        pl.BlockSpec((TB, D), lambda i: (i, 0)),                       # weights
        pl.BlockSpec((TB, N), lambda i: (i, 0)),                       # activated
        pl.BlockSpec((TB, N), lambda i: (i, 0)),                       # scores
    )
    out_shapes = (
        jax.ShapeDtypeStruct((B, D), hidden.dtype),
        jax.ShapeDtypeStruct((B, N), jnp.float32),
        jax.ShapeDtypeStruct((B, N), jnp.float32),
    )

    cost = pl.CostEstimate(
        flops=int(5 * B * N * D),                            # score (3·BND) + context (2·BND)
        transcendentals=int(B * N),                          # exp / sigmoid
        bytes_accessed=int((2 * B * N * D + B * D) * itemsize    # inputs
                           + B * D * itemsize + 2 * B * N * 4),  # outputs
    )

    return pl.pallas_call(
        kernel,
        out_shape=out_shapes,
        grid=grid,
        in_specs=in_specs,
        out_specs=out_specs,
        compiler_params=pltpu.CompilerParams(
            dimension_semantics=("parallel",),               # batch tiles across TCs
            vmem_limit_bytes=vmem_limit,
        ),
        cost_estimate=cost,
    )(hidden, slots_in, keys_in)


# ---------------------------------------------------------------------------
# Self-test
# ---------------------------------------------------------------------------
if __name__ == "__main__":
    root = jax.random.PRNGKey(0)

    def ref_forward(hidden, slots, keys, act):
        hb = hidden[:, None, :]
        scores = jnp.sum(slots * hb, axis=2) + jnp.sum(keys * hb, axis=2)
        a = jax.nn.softmax(scores, axis=1) if act == "softmax" else jax.nn.sigmoid(scores)
        w = jnp.einsum("bn,bnd->bd", a, slots)
        return w, a, scores

    def check(B, N, D, act):
        kh, ks, kk = jax.random.split(jax.random.fold_in(root, 1000 * N + D), 3)
        hidden = jax.random.normal(kh, (B, D), dtype=jnp.float32)
        slots = jax.random.normal(ks, (B, N, D), dtype=jnp.float32)
        keys_ = jax.random.normal(kk, (B, N, D), dtype=jnp.float32)

        w, a, sc = jax.block_until_ready(double_attention(hidden, slots, keys_, act=act))
        wr, ar, scr = ref_forward(hidden, slots, keys_, act)

        assert w.shape == (B, D) and a.shape == (B, N) and sc.shape == (B, N)
        assert jnp.allclose(sc, scr, atol=1e-4, rtol=1e-4), f"scores mismatch ({B},{N},{D},{act})"
        assert jnp.allclose(a, ar, atol=1e-4, rtol=1e-4), f"activation mismatch ({B},{N},{D},{act})"
        assert jnp.allclose(w, wr, atol=1e-4, rtol=1e-4), f"weights mismatch ({B},{N},{D},{act})"

    check(2, 8, 32, "softmax")     # small shape: standard layout, VPU/XLU paths
    check(2, 8, 32, "sigmoid")     # independent-attention activation
    check(4, 128, 32, "softmax")   # N>=128, D<128: lane-dense transposed layout

    print("KERNEL_OK")
</pallas_src>

<mosaic_0001>
module attributes {stable_mosaic.version = 11 : i64} {
  func.func @_double_attention_kernel(%arg0: i32, %arg1: memref<2x32xf32, #tpu.memory_space<vmem>>, %arg2: memref<2x8x32xf32, #tpu.memory_space<vmem>>, %arg3: memref<2x8x32xf32, #tpu.memory_space<vmem>>, %arg4: memref<2x32xf32, #tpu.memory_space<vmem>>, %arg5: memref<2x8xf32, #tpu.memory_space<vmem>>, %arg6: memref<2x8xf32, #tpu.memory_space<vmem>>) attributes {dimension_semantics = [#tpu.dimension_semantics<parallel>], iteration_bounds = array<i64: 1>, scalar_prefetch = 0 : i64, scratch_operands = 0 : i64, tpu.core_type = #tpu.core_type<tc>, window_params = [{transform_indices = @transform_0, window_bounds = array<i64: 2, 32>}, {transform_indices = @transform_1, window_bounds = array<i64: 2, 8, 32>}, {transform_indices = @transform_2, window_bounds = array<i64: 2, 8, 32>}, {transform_indices = @transform_3, window_bounds = array<i64: 2, 32>}, {transform_indices = @transform_4, window_bounds = array<i64: 2, 8>}, {transform_indices = @transform_5, window_bounds = array<i64: 2, 8>}]} {
    %c0 = arith.constant 0 : index
    %c0_0 = arith.constant 0 : index
    %0 = vector.load %arg1[%c0, %c0_0] : memref<2x32xf32, #tpu.memory_space<vmem>>, vector<2x32xf32>
    %c0_1 = arith.constant 0 : index
    %c0_2 = arith.constant 0 : index
    %c0_3 = arith.constant 0 : index
    %1 = vector.load %arg2[%c0_1, %c0_2, %c0_3] : memref<2x8x32xf32, #tpu.memory_space<vmem>>, vector<2x8x32xf32>
    %c0_4 = arith.constant 0 : index
    %c0_5 = arith.constant 0 : index
    %c0_6 = arith.constant 0 : index
    %2 = vector.load %arg3[%c0_4, %c0_5, %c0_6] : memref<2x8x32xf32, #tpu.memory_space<vmem>>, vector<2x8x32xf32>
    %3 = arith.addf %1, %2 : vector<2x8x32xf32>
    %4 = vector.shape_cast %0 : vector<2x32xf32> to vector<2x1x32xf32>
    %5 = vector.broadcast %4 : vector<2x1x32xf32> to vector<2x8x32xf32>
    %6 = arith.mulf %3, %5 : vector<2x8x32xf32>
    %cst = arith.constant dense<0.000000e+00> : vector<2x8xf32>
    %7 = vector.multi_reduction <add>, %6, %cst [2] : vector<2x8x32xf32> to vector<2x8xf32>
    %cst_7 = arith.constant dense<0xFF800000> : vector<2xf32>
    %8 = vector.multi_reduction <maximumf>, %7, %cst_7 [1] : vector<2x8xf32> to vector<2xf32>
    %9 = vector.shape_cast %8 : vector<2xf32> to vector<2x1xf32>
    %10 = vector.broadcast %9 : vector<2x1xf32> to vector<2x8xf32>
    %11 = arith.subf %7, %10 : vector<2x8xf32>
    %12 = math.exp %11 : vector<2x8xf32>
    %cst_8 = arith.constant dense<0.000000e+00> : vector<2xf32>
    %13 = vector.multi_reduction <add>, %12, %cst_8 [1] : vector<2x8xf32> to vector<2xf32>
    %14 = vector.shape_cast %13 : vector<2xf32> to vector<2x1xf32>
    %15 = vector.broadcast %14 : vector<2x1xf32> to vector<2x8xf32>
    %16 = arith.divf %12, %15 : vector<2x8xf32>
    %17 = vector.shape_cast %16 : vector<2x8xf32> to vector<2x8x1xf32>
    %18 = vector.broadcast %17 : vector<2x8x1xf32> to vector<2x8x32xf32>
    %19 = arith.mulf %18, %1 : vector<2x8x32xf32>
    %cst_9 = arith.constant dense<0.000000e+00> : vector<2x32xf32>
    %20 = vector.multi_reduction <add>, %19, %cst_9 [1] : vector<2x8x32xf32> to vector<2x32xf32>
    %c0_10 = arith.constant 0 : index
    %c0_11 = arith.constant 0 : index
    %21 = vector.load %arg4[%c0_10, %c0_11] : memref<2x32xf32, #tpu.memory_space<vmem>>, vector<2x32xf32>
    tpu.vector_store %arg4[%c0_10, %c0_11], %20 {strides = array<i32>} : memref<2x32xf32, #tpu.memory_space<vmem>>, vector<2x32xf32>,
    %c0_12 = arith.constant 0 : index
    %c0_13 = arith.constant 0 : index
    %22 = vector.load %arg5[%c0_12, %c0_13] : memref<2x8xf32, #tpu.memory_space<vmem>>, vector<2x8xf32>
    tpu.vector_store %arg5[%c0_12, %c0_13], %16 {strides = array<i32>} : memref<2x8xf32, #tpu.memory_space<vmem>>, vector<2x8xf32>,
    %c0_14 = arith.constant 0 : index
    %c0_15 = arith.constant 0 : index
    %23 = vector.load %arg6[%c0_14, %c0_15] : memref<2x8xf32, #tpu.memory_space<vmem>>, vector<2x8xf32>
    tpu.vector_store %arg6[%c0_14, %c0_15], %7 {strides = array<i32>} : memref<2x8xf32, #tpu.memory_space<vmem>>, vector<2x8xf32>,
    return
  }
  func.func @transform_0(%arg0: i32) -> (i32, i32) {
    %c0_i32 = arith.constant 0 : i32
    %c0_i32_0 = arith.constant 0 : i32
    return %arg0, %c0_i32 : i32, i32
  }
  func.func @transform_1(%arg0: i32) -> (i32, i32, i32) {
    %c0_i32 = arith.constant 0 : i32
    %c0_i32_0 = arith.constant 0 : i32
    %c0_i32_1 = arith.constant 0 : i32
    return %arg0, %c0_i32, %c0_i32_0 : i32, i32, i32
  }
  func.func @transform_2(%arg0: i32) -> (i32, i32, i32) {
    %c0_i32 = arith.constant 0 : i32
    %c0_i32_0 = arith.constant 0 : i32
    %c0_i32_1 = arith.constant 0 : i32
    return %arg0, %c0_i32, %c0_i32_0 : i32, i32, i32
  }
  func.func @transform_3(%arg0: i32) -> (i32, i32) {
    %c0_i32 = arith.constant 0 : i32
    %c0_i32_0 = arith.constant 0 : i32
    return %arg0, %c0_i32 : i32, i32
  }
  func.func @transform_4(%arg0: i32) -> (i32, i32) {
    %c0_i32 = arith.constant 0 : i32
    %c0_i32_0 = arith.constant 0 : i32
    return %arg0, %c0_i32 : i32, i32
  }
  func.func @transform_5(%arg0: i32) -> (i32, i32) {
    %c0_i32 = arith.constant 0 : i32
    %c0_i32_0 = arith.constant 0 : i32
    return %arg0, %c0_i32 : i32, i32
  }
}

</mosaic_0001>

<bundles_post_ra>
// kernel: tpu_custom_call.1
= control target key start
LH: loop header
LB: loop body
LE: loop exit
PB: predicated region body
PF: predicated region fallthrough
CT: control target
= control target key end

     0   :  { %11 = vsyncpa [#allocation3], 0  ;;  %s501_s0 = inlined_call_operand.hbm [shape: f32[2,32], index: 0, kind: input, shape index: {}]   ;;  %s502_s1 = inlined_call_operand.hbm [shape: f32[2,8,32], index: 1, kind: input, shape index: {}]   ;;  %s503_s2 = inlined_call_operand.hbm [shape: f32[2,8,32], index: 2, kind: input, shape index: {}]   ;;  %s504_s3 = inlined_call_operand.hbm [shape: f32[2,32], index: 3, kind: output, shape index: {0}]   ;;  %s505_s4 = inlined_call_operand.hbm [shape: f32[2,8], index: 4, kind: output, shape index: {1}]   ;;  %s506_s5 = inlined_call_operand.hbm [shape: f32[2,8], index: 5, kind: output, shape index: {2}]  }
   0x1   :  { %12 = vsyncpa [#allocation6], 0 }
   0x2   :  { %13 = vsyncpa [#allocation4], 0 }
   0x3   :  { %14 = vsyncpa [#allocation10], 0  ;;  %s415_s18 = smov [#allocation5]  }
   0x4   :  { %s30_s19 = sshll.u32 %s415_s18, 4  ;;  %s31_s19 = int_to_ptr.vmem [resolvable:$true] %s30_s19 }
   0x5   :  { %s295_s20 = scalar_lea.vmem %s31_s19, 256  ;;  %p300_p1 = scmp.lt.s32.totalorder %s31_s19, %s31_s19 }
   0x6   :  { %p296_p0 = scmp.ne.s32.totalorder %s31_s19, %s295_s20  ;;  %p301_p2 = scmp.lt.s32.totalorder %s295_s20, %s295_s20 }
   0x8   :  { %p302_p3 = por %p301_p2, %p300_p1 }
   0xa   :  { %p303_p4 = pnand %p302_p3, %p296_p0 }
   0xc   :  { %306 = shalt.err (!%p303_p4)
}
   0xd   :  { %s416_s21 = smov 128   ;;  %s417_s22 = smov 8  }
   0xe   :  { %36 = dma.hbm_to_vmem [thread:$0]  %s502_s1, 256, %s31_s19, [#allocation6], %s416_s21, %s416_s21, %s417_s22  }
   0xf   :  { %s418_s25 = smov [#allocation2]   ;;  %s419_s27 = smov [#allocation7]  }
  0x10   :  { %s21_s26 = sshll.u32 %s418_s25, 4  ;;  %s42_s28 = sshll.u32 %s419_s27, 4  ;;  %s22_s26 = int_to_ptr.vmem [resolvable:$true] %s21_s26  ;;  %s43_s28 = int_to_ptr.vmem [resolvable:$true] %s42_s28 }
  0x11   :  { %s315_s29 = scalar_lea.vmem %s22_s26, 32  ;;  %p320_p6 = scmp.lt.s32.totalorder %s22_s26, %s22_s26 }
  0x12   :  { %p316_p5 = scmp.ne.s32.totalorder %s22_s26, %s315_s29  ;;  %p321_p7 = scmp.lt.s32.totalorder %s315_s29, %s315_s29 }
  0x14   :  { %p322_p8 = por %p321_p7, %p320_p6 }
  0x16   :  { %p323_p9 = pnand %p322_p8, %p316_p5 }
  0x18   :  { %326 = shalt.err (!%p323_p9)
}
  0x19   :  { %24 = dma.hbm_to_vmem [thread:$0]  %s501_s0, 32, %s22_s26, [#allocation3]  }
  0x1a   :  { %s335_s7 = scalar_lea.vmem %s43_s28, 256  ;;  %p340_p11 = scmp.lt.s32.totalorder %s43_s28, %s43_s28 }
  0x1b   :  { %p336_p10 = scmp.ne.s32.totalorder %s43_s28, %s335_s7  ;;  %p341_p12 = scmp.lt.s32.totalorder %s335_s7, %s335_s7 }
  0x1d   :  { %p342_p13 = por %p341_p12, %p340_p11 }
  0x1f   :  { %p343_p0 = pnand %p342_p13, %p336_p10 }
  0x21   :  { %346 = shalt.err (!%p343_p0)
}
  0x22   :  { %48 = dma.hbm_to_vmem [thread:$0]  %s503_s2, 256, %s43_s28, [#allocation6], %s416_s21, %s416_s21, %s417_s22  }
  0x23   :  { %407 = dma.done.wait [#allocation3], 32  }
  0x24   :  { %408 = vsyncadd [#allocation3], 4294967264 }
  0x25   :  { %409 = dma.done.wait [#allocation6], 512  }
  0x26   :  { %410 = vsyncadd [#allocation6], 4294966784  ;;  %v77_v0 = vlaneseq  ;;  %v420_v1 = vmov 1966171168   ;;  %v466_v10 = vld [vmem:[#allocation5] sm:$0xff]  ;;  %v61_v11 = vld [vmem:[#allocation7] sm:$0xff] }
  0x27   :  { %v75_v2 = vunpack.c.l.s4 %v420_v1  ;;  %v266_v9 = vld.sshfl [vmem:[#allocation2] sm:$0x11 pattern:$0x75316420]  ;;  %v63_v12 = vadd.f32 %v61_v11, %v466_v10  ;;  %v469_v15 = vld [vmem:[#allocation5 + $0x8] sm:$0xff]  ;;  %vm100_vm0 = vcmask 261120  }
  0x28   :  { %v78_v3 = vshrl.u32 %v77_v0, 7  ;;  %v110_v4 = vand.u32 127, %v77_v0  ;;  %v73_v14 = vcombine.high %v266_v9, %v266_v9  ;;  %v62_v16 = vld [vmem:[#allocation7 + $0x8] sm:$0xff]  ;;  %vm119_vm1 = vcmask 1041409   ;;  %s422_s0 = smov [#allocation9]   ;;  %s423_s9 = smov [#allocation11]  }
  0x29   :  { %v76_v5 = vunpack.c.0.s8 %v75_v2  ;;  %v64_v18 = vadd.f32 %v62_v16, %v469_v15  ;;  %vm122_vm2 = vcmask 58368   ;;  %v421_v31 = vmov 0   ;;  %s239_s2 = sshll.u32 %s422_s0, 4  ;;  %s249_s10 = sshll.u32 %s423_s9, 4  ;;  %s240_s2 = int_to_ptr.vmem [resolvable:$true] %s239_s2  ;;  %s250_s10 = int_to_ptr.vmem [resolvable:$true] %s249_s10 }
  0x2a   :  { %v464_v6 = vsub.s32 %v110_v4, %v78_v3  ;;  %v90_v8 = vsub.s32 0, %v78_v3  ;;  %278 = vset.pattern.permute.xlu0 %v421_v31  ;;  %277 = vset.pattern.permute.xlu1 %v421_v31  ;;  %v133_v32 = vsub.s32 1, %v78_v3  ;;  %s347_s11 = scalar_lea.vmem %s240_s2, 32  ;;  %p352_p2 = scmp.lt.s32.totalorder %s240_s2, %s240_s2 }
  0x2b   :  { %v79_v7 = vsub.s32 %v76_v5, %v78_v3  ;;  %p348_p1 = scmp.ne.s32.totalorder %s240_s2, %s347_s11  ;;  %p353_p3 = scmp.lt.s32.totalorder %s347_s11, %s347_s11 }
  0x2d   :  { %v80_v13 = vrot.slane %v266_v9, %v79_v7  ;;  %v87_v19 = vrot.slane %v73_v14, %v79_v7  ;;  %p354_p4 = por %p353_p3, %p352_p2 }
  0x2f   :  { %v91_v17 = vrot.slane %v80_v13, %v90_v8  ;;  %v95_v21 = vrot.slane %v87_v19, %v90_v8  ;;  %p355_p5 = pnand %p354_p4, %p348_p1 }
  0x31   :  { %v98_v20 = vmul.f32 %v91_v17, %v63_v12  ;;  %v99_v23 = vmul.f32 %v95_v21, %v64_v18 }
  0x33   :  { %v101_v22 = vsel %vm100_vm0, %v98_v20, 0.0  ;;  %v104_v24 = vsel %vm100_vm0, %v99_v23, 0.0 }
  0x34   :  { %102 = vadd.xlane.f32.xlu0 %v101_v22 }
  0x38   :  { %105 = vadd.xlane.f32.xlu0 %v104_v24 }
  0xbd   :  { %v103_v25 = vpop.xlane.xlu0 %102 }
  0xbe   :  { %v114_v27 = vrot.slane %v103_v25, %v464_v6 }
  0xc1   :  { %v106_v26 = vpop.xlane.xlu0 %105 }
  0xc2   :  { %v118_v28 = vrot.slane %v106_v26, %v464_v6 }
  0xc4   :  { %v120_v29 = vsel %vm119_vm1, %v118_v28, %v114_v27 }
  0xc5   :  { %v123_v30 = vsel %vm122_vm2, %v120_v29, -inf  ;;  %222 = vst.msk [vmem:[#allocation11] sm:$0x3] %vm122_vm2, %v120_v29 }
  0xc6   :  { %124 = vmax.xlane.f32.xlu1 %v123_v30 }
 0x14f   :  { %v125_v33 = vpop.xlane.xlu1 %124 }
 0x150   :  { %v130_v34 = vrot.slane %v125_v33, %v90_v8  ;;  %v134_v35 = vrot.slane %v125_v33, %v133_v32 }
 0x152   :  { %v137_v36 = vsub.f32 %v103_v25, %v130_v34  ;;  %v138_v37 = vsub.f32 %v106_v26, %v134_v35 }
 0x154   :  { %v139_v38 = vmul.f32 1.442695, %v137_v36  ;;  %v141_v39 = vmul.f32 1.442695, %v138_v37 }
 0x156   :  { %279 = vpow2.f32 %v139_v38 }
 0x157   :  { %281 = vpow2.f32 %v141_v39 }
 0x163   :  { %v280_v40 = vpop.eup %279 }
 0x164   :  { %v282_v41 = vpop.eup %281  ;;  %146 = vperm.xlu1 %277, %v280_v40  }
 0x165   :  { %149 = vperm.xlu0 %278, %v282_v41  }
 0x1df   :  { %v147_v42 = vpop.permute.xlu1 %146 }
 0x1e0   :  { %v150_v43 = vpop.permute.xlu0 %149  ;;  %v154_v44 = vrot.slane %v147_v42, %v464_v6 }
 0x1e1   :  { %v158_v45 = vrot.slane %v150_v43, %v464_v6 }
 0x1e3   :  { %v159_v46 = vsel %vm119_vm1, %v158_v45, %v154_v44 }
 0x1e4   :  { %v161_v47 = vsel %vm122_vm2, %v159_v46, 0.0 }
 0x1e5   :  { %162 = vadd.xlane.f32.xlu1 %v161_v47 }
 0x26e   :  { %v163_v48 = vpop.xlane.xlu1 %162 }
 0x26f   :  { %v168_v49 = vrot.slane %v163_v48, %v90_v8  ;;  %v172_v50 = vrot.slane %v163_v48, %v133_v32 }
 0x271   :  { %283 = vrcp.f32 %v168_v49 }
 0x272   :  { %285 = vrcp.f32 %v172_v50 }
 0x27e   :  { %v284_v51 = vpop.eup %283 }
 0x27f   :  { %v176_v52 = vmul.f32 %v284_v51, %v280_v40  ;;  %v286_v53 = vpop.eup %285 }
 0x280   :  { %v178_v54 = vmul.f32 %v286_v53, %v282_v41 }
 0x281   :  { %181 = vperm.xlu0 %278, %v176_v52  }
 0x285   :  { %186 = vperm.xlu0 %278, %v178_v54  }
 0x2fc   :  { %v182_v55 = vpop.permute.xlu0 %181 }
 0x2fd   :  { %v189_v56 = vmul.f32 %v182_v55, %v466_v10  ;;  %v214_v60 = vrot.slane %v182_v55, %v464_v6 }
 0x2ff   :  { %v191_v57 = vsel %vm100_vm0, %v189_v56, 0.0 }
 0x300   :  { %v192_v58 = vrot.slane %v191_v57, 4  ;;  %v187_v59 = vpop.permute.xlu0 %186 }
 0x301   :  { %v190_v61 = vmul.f32 %v187_v59, %v469_v15  ;;  %v218_v62 = vrot.slane %v187_v59, %v464_v6 }
 0x302   :  { %v193_v63 = vadd.f32 %v192_v58, %v191_v57 }
 0x303   :  { %v198_v0 = vsel %vm100_vm0, %v190_v61, 0.0  ;;  %v219_v1 = vsel %vm119_vm1, %v218_v62, %v214_v60 }
 0x304   :  { %v194_v2 = vrot.slane %v193_v63, 2  ;;  %v199_v3 = vrot.slane %v198_v0, 4  ;;  %221 = vst.msk [vmem:[#allocation9] sm:$0x3] %vm122_vm2, %v219_v1 }
 0x305   :  { %358 = shalt.err (!%p355_p5)
}
 0x306   :  { %242 = dma.vmem_to_hbm [thread:$0]  %s240_s2, 32, %s505_s4, [#allocation10]   ;;  %v195_v4 = vadd.f32 %v194_v2, %v193_v63  ;;  %v200_v5 = vadd.f32 %v199_v3, %v198_v0 }
 0x307   :  { %s367_s14 = scalar_lea.vmem %s250_s10, 32  ;;  %p372_p7 = scmp.lt.s32.totalorder %s250_s10, %s250_s10 }
 0x308   :  { %p368_p6 = scmp.ne.s32.totalorder %s250_s10, %s367_s14  ;;  %p373_p8 = scmp.lt.s32.totalorder %s367_s14, %s367_s14 }
 0x30a   :  { %p374_p9 = por %p373_p8, %p372_p7 }
 0x30c   :  { %p375_p10 = pnand %p374_p9, %p368_p6 }
 0x30e   :  { %378 = shalt.err (!%p375_p10)
}
 0x30f   :  { %252 = dma.vmem_to_hbm [thread:$0]  %s250_s10, 32, %s506_s5, [#allocation10]   ;;  %v201_v6 = vrot.slane %v200_v5, 2  ;;  %v196_v7 = vrot.slane %v195_v4, 1  ;;  %vm209_vm3 = vcmask 254976  }
 0x310   :  { %s424_s17 = smov [#allocation8]  }
 0x311   :  { %v202_v8 = vadd.f32 %v201_v6, %v200_v5  ;;  %s229_s18 = sshll.u32 %s424_s17, 4  ;;  %v197_v11 = vadd.f32 %v196_v7, %v195_v4  ;;  %s230_s18 = int_to_ptr.vmem [resolvable:$true] %s229_s18 }
 0x312   :  { %s387_s4 = scalar_lea.vmem %s230_s18, 32  ;;  %p392_p12 = scmp.lt.s32.totalorder %s230_s18, %s230_s18 }
 0x313   :  { %v203_v9 = vrot.slane %v202_v8, 1  ;;  %p388_p11 = scmp.ne.s32.totalorder %s230_s18, %s387_s4  ;;  %p393_p13 = scmp.lt.s32.totalorder %s387_s4, %s387_s4 }
 0x315   :  { %v204_v10 = vadd.f32 %v203_v9, %v202_v8  ;;  %p394_p0 = por %p393_p13, %p392_p12 }
 0x317   :  { %v207_v12 = vsel %vm119_vm1, %v204_v10, %v197_v11  ;;  %p395_p1 = pnand %p394_p0, %p388_p11 }
 0x318   :  { %210 = vst.msk [vmem:[#allocation8] sm:$0x3] %vm209_vm3, %v207_v12 }
 0x319   :  { %398 = shalt.err (!%p395_p1)
}
 0x31a   :  { %232 = dma.vmem_to_hbm [thread:$0]  %s230_s18, 32, %s504_s3, [#allocation4]  }
 0x31b   :  { %411 = dma.done.wait [#allocation4], 32  }
 0x31c   :  { %412 = vsyncadd [#allocation4], 4294967264 }
 0x31d   :  { %413 = dma.done.wait [#allocation10], 64  }
 0x31e   :  { %414 = vsyncadd [#allocation10], 4294967232 }
 0x31f   :  { %262 = vsyncpa [#allocation3], 1 }
 0x320   :  { %263 = vsyncpa [#allocation6], 1 }
 0x321   :  { %264 = vsyncpa [#allocation4], 1 }
 0x322   :  { %265 = vsyncpa [#allocation10], 1 }

</bundles_post_ra>
